<compile_context>
chip_gen: v6e
topology: v6e:2x2x1
jax: 0.10.0
libtpu: 0.0.40
codegen_flags: <defaults>
</compile_context>

<pallas_src>
import jax
import jax.numpy as jnp
from jax import lax
from jax.experimental import pallas as pl
from jax.experimental.pallas import tpu as pltpu


def _round_up(x: int, m: int) -> int:
    return ((x + m - 1) // m) * m


def _sublane_multiple(dtype) -> int:
    itemsize = jnp.dtype(dtype).itemsize
    if itemsize == 2:
        return 16
    if itemsize == 1:
        return 32
    return 8


def _vmem_capacity_bytes() -> int:
    """Per-TensorCore VMEM capacity; conservative fallback if query fails."""
    try:
        info = pltpu.get_tpu_info()
        cap = getattr(info, "vmem_capacity_bytes", None)
        if cap:
            return int(cap)
    except Exception:
        pass
    return 64 * 1024 * 1024  # v7x per-TC VMEM (smallest of v5e/v6e/v7x)


def _is_v5e() -> bool:
    try:
        kind = jax.devices()[0].device_kind.lower()
        return ("v5 lite" in kind) or ("v5e" in kind) or ("v5litepod" in kind)
    except Exception:
        return False


def _footprint_bytes(tm, tn, tk, in_itemsize, out_itemsize, with_bias) -> int:
    # Double-buffered x / weight / output tiles + resident f32 accumulator.
    fp = (2 * tm * tk * in_itemsize          # x tile
          + 2 * tn * tk * in_itemsize        # weight tile
          + 2 * tm * tn * out_itemsize       # output tile
          + tm * tn * 4)                     # f32 accumulator scratch
    if with_bias:
        fp += 2 * 1 * tn * 4                 # bias tile
    return fp


def _pick_tiles(M, N, K, in_dtype, out_dtype, with_bias):
    sub = _sublane_multiple(in_dtype)
    in_is = jnp.dtype(in_dtype).itemsize
    out_is = jnp.dtype(out_dtype).itemsize

    vmem_cap = _vmem_capacity_bytes()
    budget = int(vmem_cap * 0.55)            # tile footprint target (headroom)

    # Generation-aware caps: big tiles on v6e/v7x; v5e hits its roofline ~512.
    if _is_v5e():
        tm_cap, tn_cap, tk_cap = 512, 512, 1024
    elif vmem_cap >= 96 * 1024 * 1024:       # 128 MiB VMEM class (v5e/v6e)
        tm_cap, tn_cap, tk_cap = 1024, 1024, 2048
    else:                                    # 64 MiB per-TC class (v7x)
        tm_cap, tn_cap, tk_cap = 1024, 1024, 1024

    m_full = _round_up(M, sub)
    n_full = _round_up(N, 128)
    k_full = _round_up(K, 128)

    tm = min(tm_cap, m_full)
    tn = min(tn_cap, n_full)
    tk = min(tk_cap, k_full)

    def fp(a, b, c):
        return _footprint_bytes(a, b, c, in_is, out_is, with_bias)

    # Shrink tk first (cheapest: only reduces K-reuse), then tn, then tm.
    while fp(tm, tn, tk) > budget and tk > 128:
        tk = max(128, _round_up(tk // 2, 128))
    while fp(tm, tn, tk) > budget and tn > 128:
        tn = max(128, _round_up(tn // 2, 128))
    while fp(tm, tn, tk) > budget and tm > sub:
        tm = max(sub, _round_up(tm // 2, sub))

    # Guarantee a parallel grid extent >= 2 (both v7x TensorCores busy) when
    # the whole (M, N) output would otherwise be a single block and N splits
    # cleanly into two lane-dense halves.
    if m_full <= tm and n_full <= tn and (n_full % 256 == 0):
        tn = n_full // 2

    footprint = fp(tm, tn, tk)
    vmem_limit = max(footprint + (16 << 20), 32 << 20)
    vmem_limit = min(vmem_limit, int(vmem_cap * 0.8))
    vmem_limit = max(vmem_limit, footprint + (4 << 20))
    return tm, tn, tk, vmem_limit


def _make_kernel(with_bias: bool, act_fn):
    """Build a kernel variant (bias / no-bias) with act_fn fused (None = Identity)."""

    if with_bias:
        def kernel(x_ref, w_ref, b_ref, o_ref, acc_ref):
            k = pl.program_id(2)

            @pl.when(k == 0)
            def _():
                # Init the accumulator from the broadcast bias (saves a zero
                # store + a tm x tn VPU add in the epilogue).
                acc_ref[...] = jnp.broadcast_to(
                    b_ref[...].astype(jnp.float32), acc_ref.shape)

            # x: [tm, tk], w: [tn, tk] -> [tm, tn]; MXU native trans-B.
            acc_ref[...] += lax.dot_general(
                x_ref[...], w_ref[...],
                dimension_numbers=(((1,), (1,)), ((), ())),
                preferred_element_type=jnp.float32)

            @pl.when(k == pl.num_programs(2) - 1)
            def _():
                y = acc_ref[...]
                if act_fn is not None:
                    y = act_fn(y)                  # fused, still f32
                o_ref[...] = y.astype(o_ref.dtype)

        return kernel

    def kernel(x_ref, w_ref, o_ref, acc_ref):
        k = pl.program_id(2)

        @pl.when(k == 0)
        def _():
            acc_ref[...] = jnp.zeros_like(acc_ref)

        acc_ref[...] += lax.dot_general(
            x_ref[...], w_ref[...],
            dimension_numbers=(((1,), (1,)), ((), ())),
            preferred_element_type=jnp.float32)

        @pl.when(k == pl.num_programs(2) - 1)
        def _():
            y = acc_ref[...]
            if act_fn is not None:
                y = act_fn(y)
            o_ref[...] = y.astype(o_ref.dtype)

    return kernel


def linear_block(x, weight, bias=None, act_func=None, *,
                 tm=None, tn=None, tk=None):
    """Forward pass of LinearBlock: act_func(x @ weight.T + bias).

    x:        [M, in_features]
    weight:   [out_features, in_features]   (PyTorch nn.Linear convention)
    bias:     [out_features] or None
    act_func: optional JAX *elementwise* callable, fused into the kernel
              (None -> Identity, matching the PyTorch default).
    """
    M, K = x.shape
    N, K_w = weight.shape
    assert K == K_w, "in_features mismatch between x and weight"

    with_bias = bias is not None
    out_dtype = x.dtype

    a_tm, a_tn, a_tk, vmem_limit = _pick_tiles(
        M, N, K, x.dtype, out_dtype, with_bias)
    tm = tm or a_tm
    tn = tn or a_tn
    tk = tk or a_tk

    Mp, Np, Kp = _round_up(M, tm), _round_up(N, tn), _round_up(K, tk)

    # Pad only when a dim isn't already tile-aligned (zeros contribute nothing
    # to the dot / bias; common model dims take no extra HBM pass over W).
    xp = x if (Mp == M and Kp == K) else jnp.pad(x, ((0, Mp - M), (0, Kp - K)))
    wp = weight if (Np == N and Kp == K) else jnp.pad(
        weight, ((0, Np - N), (0, Kp - K)))

    kernel = _make_kernel(with_bias, act_func)

    grid = (Mp // tm, Np // tn, Kp // tk)

    in_specs = [
        pl.BlockSpec((tm, tk), lambda i, j, k: (i, k)),   # x tile
        pl.BlockSpec((tn, tk), lambda i, j, k: (j, k)),   # weight tile [out,in]
    ]
    operands = [xp, wp]

    if with_bias:
        bp = bias.astype(jnp.float32).reshape(1, N)
        if Np != N:
            bp = jnp.pad(bp, ((0, 0), (0, Np - N)))
        in_specs.append(pl.BlockSpec((1, tn), lambda i, j, k: (0, j)))
        operands.append(bp)

    out = pl.pallas_call(
        kernel,
        out_shape=jax.ShapeDtypeStruct((Mp, Np), out_dtype),
        grid_spec=pltpu.PrefetchScalarGridSpec(
            num_scalar_prefetch=0,
            grid=grid,
            in_specs=in_specs,
            out_specs=pl.BlockSpec((tm, tn), lambda i, j, k: (i, j)),
            scratch_shapes=[pltpu.VMEM((tm, tn), jnp.float32)],
        ),
        compiler_params=pltpu.CompilerParams(
            dimension_semantics=("parallel", "parallel", "arbitrary"),
            vmem_limit_bytes=vmem_limit,
        ),
    )(*operands)

    if Mp != M or Np != N:
        out = out[:M, :N]
    return out


if __name__ == "__main__":
    key = jax.random.PRNGKey(0)
    k_x, k_w, k_b = jax.random.split(key, 3)

    batch = 8
    in_features = 32
    out_features = 64

    # Deterministic synthetic parameters (PyTorch-like uniform init bounds).
    bound = 1.0 / float(jnp.sqrt(in_features))
    x = jax.random.normal(k_x, (batch, in_features), dtype=jnp.float32)
    weight = jax.random.uniform(
        k_w, (out_features, in_features), minval=-bound, maxval=bound,
        dtype=jnp.float32)
    bias = jax.random.uniform(
        k_b, (out_features,), minval=-bound, maxval=bound, dtype=jnp.float32)

    # Case 1: bias=True, act_func=None (Identity) -- the module's default.
    y = linear_block(x, weight, bias)
    y = jax.block_until_ready(y)
    y_ref = x @ weight.T + bias
    assert y.shape == (batch, out_features)
    assert jnp.allclose(y, y_ref, atol=1e-5, rtol=1e-5)

    # Case 2: bias=False, act_func=ReLU fused in-kernel.
    y2 = linear_block(x, weight, bias=None, act_func=jax.nn.relu)
    y2 = jax.block_until_ready(y2)
    y2_ref = jnp.maximum(x @ weight.T, 0.0)
    assert jnp.allclose(y2, y2_ref, atol=1e-5, rtol=1e-5)

    # Case 3: bf16 inputs (f32 accumulation inside the kernel), sublane=16 path.
    xb = x.astype(jnp.bfloat16)
    wb = weight.astype(jnp.bfloat16)
    y3 = linear_block(xb, wb, bias)
    y3 = jax.block_until_ready(y3)
    y3_ref = xb.astype(jnp.float32) @ wb.astype(jnp.float32).T + bias
    assert jnp.allclose(y3.astype(jnp.float32), y3_ref, atol=3e-2, rtol=3e-2)

    print("KERNEL_OK")
</pallas_src>

<mosaic_0001>
module attributes {stable_mosaic.version = 11 : i64} {
  func.func @kernel(%arg0: i32, %arg1: i32, %arg2: i32, %arg3: memref<8x128xf32, #tpu.memory_space<vmem>>, %arg4: memref<128x128xf32, #tpu.memory_space<vmem>>, %arg5: memref<1x128xf32, #tpu.memory_space<vmem>>, %arg6: memref<8x128xf32, #tpu.memory_space<vmem>>, %arg7: memref<8x128xf32, #tpu.memory_space<vmem>>) attributes {dimension_semantics = [#tpu.dimension_semantics<parallel>, #tpu.dimension_semantics<parallel>, #tpu.dimension_semantics<arbitrary>], iteration_bounds = array<i64: 1, 1, 1>, scalar_prefetch = 0 : i64, scratch_operands = 1 : i64, tpu.core_type = #tpu.core_type<tc>, window_params = [{transform_indices = @transform_0, window_bounds = array<i64: 8, 128>}, {transform_indices = @transform_1, window_bounds = array<i64: 128, 128>}, {transform_indices = @transform_2, window_bounds = array<i64: 1, 128>}, {transform_indices = @transform_3, window_bounds = array<i64: 8, 128>}]} {
    %c0_i32 = arith.constant 0 : i32
    %0 = arith.cmpi eq, %arg2, %c0_i32 : i32
    %1 = arith.extui %0 : i1 to i32
    %c0_i32_0 = arith.constant 0 : i32
    %2 = arith.cmpi ne, %1, %c0_i32_0 : i32
    scf.if %2 {
      %c0_10 = arith.constant 0 : index
      %c0_11 = arith.constant 0 : index
      %12 = vector.load %arg5[%c0_10, %c0_11] : memref<1x128xf32, #tpu.memory_space<vmem>>, vector<1x128xf32>
      %13 = vector.shape_cast %12 : vector<1x128xf32> to vector<1x128xf32>
      %14 = vector.broadcast %13 : vector<1x128xf32> to vector<8x128xf32>
      %c0_12 = arith.constant 0 : index
      %c0_13 = arith.constant 0 : index
      %15 = vector.load %arg7[%c0_12, %c0_13] : memref<8x128xf32, #tpu.memory_space<vmem>>, vector<8x128xf32>
      tpu.vector_store %arg7[%c0_12, %c0_13], %14 {strides = array<i32>} : memref<8x128xf32, #tpu.memory_space<vmem>>, vector<8x128xf32>,
    } else {
    }
    %c0 = arith.constant 0 : index
    %c0_1 = arith.constant 0 : index
    %3 = vector.load %arg7[%c0, %c0_1] : memref<8x128xf32, #tpu.memory_space<vmem>>, vector<8x128xf32>
    %c0_2 = arith.constant 0 : index
    %c0_3 = arith.constant 0 : index
    %4 = vector.load %arg3[%c0_2, %c0_3] : memref<8x128xf32, #tpu.memory_space<vmem>>, vector<8x128xf32>
    %c0_4 = arith.constant 0 : index
    %c0_5 = arith.constant 0 : index
    %5 = vector.load %arg4[%c0_4, %c0_5] : memref<128x128xf32, #tpu.memory_space<vmem>>, vector<128x128xf32>
    %cst = arith.constant dense<0.000000e+00> : vector<8x128xf32>
    %6 = tpu.matmul %4, %5, %cst {dimension_numbers = #tpu.dot_dimension_numbers<[1], [1], [0], [0], [0, 0, 1, 0], [], []>} : vector<8x128xf32>, vector<128x128xf32>, vector<8x128xf32> -> vector<8x128xf32>
    %7 = arith.addf %3, %6 : vector<8x128xf32>
    %c0_6 = arith.constant 0 : index
    %c0_7 = arith.constant 0 : index
    %8 = vector.load %arg7[%c0_6, %c0_7] : memref<8x128xf32, #tpu.memory_space<vmem>>, vector<8x128xf32>
    tpu.vector_store %arg7[%c0_6, %c0_7], %7 {strides = array<i32>} : memref<8x128xf32, #tpu.memory_space<vmem>>, vector<8x128xf32>,
    %c0_i32_8 = arith.constant 0 : i32
    %9 = arith.cmpi eq, %arg2, %c0_i32_8 : i32
    %10 = arith.extui %9 : i1 to i32
    %c0_i32_9 = arith.constant 0 : i32
    %11 = arith.cmpi ne, %10, %c0_i32_9 : i32
    scf.if %11 {
      %c0_10 = arith.constant 0 : index
      %c0_11 = arith.constant 0 : index
      %12 = vector.load %arg7[%c0_10, %c0_11] : memref<8x128xf32, #tpu.memory_space<vmem>>, vector<8x128xf32>
      %c0_12 = arith.constant 0 : index
      %c0_13 = arith.constant 0 : index
      %13 = vector.load %arg6[%c0_12, %c0_13] : memref<8x128xf32, #tpu.memory_space<vmem>>, vector<8x128xf32>
      tpu.vector_store %arg6[%c0_12, %c0_13], %12 {strides = array<i32>} : memref<8x128xf32, #tpu.memory_space<vmem>>, vector<8x128xf32>,
    } else {
    }
    return
  }
  func.func @transform_0(%arg0: i32, %arg1: i32, %arg2: i32) -> (i32, i32) {
    %c0_i32 = arith.constant 0 : i32
    return %arg0, %arg2 : i32, i32
  }
  func.func @transform_1(%arg0: i32, %arg1: i32, %arg2: i32) -> (i32, i32) {
    %c0_i32 = arith.constant 0 : i32
    return %arg1, %arg2 : i32, i32
  }
  func.func @transform_2(%arg0: i32, %arg1: i32, %arg2: i32) -> (i32, i32) {
    %c0_i32 = arith.constant 0 : i32
    %c0_i32_0 = arith.constant 0 : i32
    return %c0_i32, %arg1 : i32, i32
  }
  func.func @transform_3(%arg0: i32, %arg1: i32, %arg2: i32) -> (i32, i32) {
    %c0_i32 = arith.constant 0 : i32
    return %arg0, %arg1 : i32, i32
  }
}

</mosaic_0001>

<bundles_post_ra>
// kernel: tpu_custom_call.1
= control target key start
LH: loop header
LB: loop body
LE: loop exit
PB: predicated region body
PF: predicated region fallthrough
CT: control target
= control target key end

     0   :  { %8 = vsyncpa [#allocation4], 0  ;;  %s329_s0 = inlined_call_operand.hbm [shape: f32[8,128], index: 0, kind: input, shape index: {}]   ;;  %s330_s1 = inlined_call_operand.hbm [shape: f32[128,128], index: 1, kind: input, shape index: {}]   ;;  %s331_s2 = inlined_call_operand.vmem [shape: f32[1,128], index: 2, kind: input, shape index: {}]   ;;  %s332_s3 = inlined_call_operand.hbm [shape: f32[8,128], index: 3, kind: output, shape index: {}]  }
   0x1   :  { %9 = vsyncpa [#allocation7], 0 }
   0x2   :  { %10 = vsyncpa [#allocation5], 0  ;;  %s290_s12 = smov [#allocation3]   ;;  %s291_s14 = smov [#allocation6]  }
   0x3   :  { %s17_s13 = sshll.u32 %s290_s12, 4  ;;  %s26_s15 = sshll.u32 %s291_s14, 4  ;;  %s18_s13 = int_to_ptr.vmem [resolvable:$true] %s17_s13  ;;  %s27_s15 = int_to_ptr.vmem [resolvable:$true] %s26_s15 }
   0x4   :  { %s232_s16 = scalar_lea.vmem %s18_s13, 128  ;;  %p237_p1 = scmp.lt.s32.totalorder %s18_s13, %s18_s13 }
   0x5   :  { %p233_p0 = scmp.ne.s32.totalorder %s18_s13, %s232_s16  ;;  %p238_p2 = scmp.lt.s32.totalorder %s232_s16, %s232_s16 }
   0x7   :  { %p239_p3 = por %p238_p2, %p237_p1 }
   0x9   :  { %p240_p4 = pnand %p239_p3, %p233_p0 }
   0xb   :  { %243 = shalt.err (!%p240_p4)
}
   0xc   :  { %20 = dma.hbm_to_vmem [thread:$0]  %s329_s0, 128, %s18_s13, [#allocation4]  }
   0xd   :  { %s252_s19 = scalar_lea.vmem %s27_s15, 2048  ;;  %p257_p6 = scmp.lt.s32.totalorder %s27_s15, %s27_s15 }
   0xe   :  { %p253_p5 = scmp.ne.s32.totalorder %s27_s15, %s252_s19  ;;  %p258_p7 = scmp.lt.s32.totalorder %s252_s19, %s252_s19 }
  0x10   :  { %p259_p8 = por %p258_p7, %p257_p6 }
  0x12   :  { %p260_p9 = pnand %p259_p8, %p253_p5 }
  0x14   :  { %263 = shalt.err (!%p260_p9)
}
  0x15   :  { %s292_s20 = smov 128   ;;  %s293_s21 = smov 8  }
  0x16   :  { %32 = dma.hbm_to_vmem [thread:$0]  %s330_s1, 2048, %s27_s15, [#allocation7], %s292_s20, %s292_s20, %s293_s21  }
  0x17   :  { %284 = dma.done.wait [#allocation4], 128  }
  0x18   :  { %285 = vsyncadd [#allocation4], 4294967168 }
  0x19   :  { %286 = dma.done.wait [#allocation7], 2048  }
  0x1a   :  { %287 = vsyncadd [#allocation7], 4294965248  ;;  %v294_v0 = vmov 0.0   ;;  %vm295_vm0 = vmmov 0   ;;  %v70_v1 = vld [vmem:[#allocation6 + $0x78] sm:$0xff]  ;;  %v69_v2 = vld [vmem:[#allocation6 + $0x70] sm:$0xff] }
  0x1b   :  { %182 = vmatprep.subr.mxu0 %v294_v0  ;;  %214 = vmatprep.mubr.msk.f32.mxu0 %vm295_vm0, %v294_v0  ;;  %v68_v3 = vld [vmem:[#allocation6 + $0x68] sm:$0xff]  ;;  %v67_v4 = vld [vmem:[#allocation6 + $0x60] sm:$0xff]  ;;  %v66_v5 = vld [vmem:[#allocation6 + $0x58] sm:$0xff]  ;;  %s296_s24 = smov [#allocation8]  }
  0x1c   :  { %183 = vmatpush3.xpose.msra.mxu0 %v70_v1  ;;  %v65_v6 = vld [vmem:[#allocation6 + $0x50] sm:$0xff]  ;;  %v64_v7 = vld [vmem:[#allocation6 + $0x48] sm:$0xff]  ;;  %v63_v8 = vld [vmem:[#allocation6 + $0x40] sm:$0xff]  ;;  %s154_s25 = sshll.u32 %s296_s24, 4  ;;  %s155_s25 = int_to_ptr.vmem [resolvable:$true] %s154_s25 }
  0x1d   :  { %184 = vmatprep.subr.mxu0 %v294_v0  ;;  %v62_v9 = vld [vmem:[#allocation6 + $0x38] sm:$0xff]  ;;  %v61_v10 = vld [vmem:[#allocation6 + $0x30] sm:$0xff]  ;;  %v60_v11 = vld [vmem:[#allocation6 + $0x28] sm:$0xff]  ;;  %s264_s26 = scalar_lea.vmem %s155_s25, 128  ;;  %p269_p11 = scmp.lt.s32.totalorder %s155_s25, %s155_s25 }
  0x1e   :  { %v59_v12 = vld [vmem:[#allocation6 + $0x20] sm:$0xff]  ;;  %v58_v13 = vld [vmem:[#allocation6 + $0x18] sm:$0xff]  ;;  %v57_v14 = vld [vmem:[#allocation6 + $0x10] sm:$0xff]  ;;  %p265_p10 = scmp.ne.s32.totalorder %s155_s25, %s264_s26  ;;  %p270_p12 = scmp.lt.s32.totalorder %s264_s26, %s264_s26 }
  0x1f   :  { %v56_v15 = vld [vmem:[#allocation6 + $0x8] sm:$0xff]  ;;  %v55_v16 = vld [vmem:[#allocation6] sm:$0xff]  ;;  %v54_v17 = vld [vmem:[#allocation3] sm:$0xff] }
  0x20   :  { %185 = vmatpush3.xpose.msra.mxu0 %v69_v2  ;;  %v164_v18 = vld [vmem:[%s331_s2] ss:$0 sm:$0xff]  ;;  %p271_p13 = por %p270_p12, %p269_p11 }
  0x21   :  { %186 = vmatprep.subr.mxu0 %v294_v0 }
  0x22   :  { %p272_p0 = pnand %p271_p13, %p265_p10 }
  0x24   :  { %187 = vmatpush3.xpose.msra.mxu0 %v68_v3 }
  0x25   :  { %188 = vmatprep.subr.mxu0 %v294_v0 }
  0x28   :  { %189 = vmatpush3.xpose.msra.mxu0 %v67_v4 }
  0x29   :  { %190 = vmatprep.subr.mxu0 %v294_v0 }
  0x2c   :  { %191 = vmatpush3.xpose.msra.mxu0 %v66_v5 }
  0x2d   :  { %192 = vmatprep.subr.mxu0 %v294_v0 }
  0x30   :  { %193 = vmatpush3.xpose.msra.mxu0 %v65_v6 }
  0x31   :  { %194 = vmatprep.subr.mxu0 %v294_v0 }
  0x34   :  { %195 = vmatpush3.xpose.msra.mxu0 %v64_v7 }
  0x35   :  { %196 = vmatprep.subr.mxu0 %v294_v0 }
  0x38   :  { %197 = vmatpush3.xpose.msra.mxu0 %v63_v8 }
  0x39   :  { %198 = vmatprep.subr.mxu0 %v294_v0 }
  0x3c   :  { %199 = vmatpush3.xpose.msra.mxu0 %v62_v9 }
  0x3d   :  { %200 = vmatprep.subr.mxu0 %v294_v0 }
  0x40   :  { %201 = vmatpush3.xpose.msra.mxu0 %v61_v10 }
  0x41   :  { %202 = vmatprep.subr.mxu0 %v294_v0 }
  0x44   :  { %203 = vmatpush3.xpose.msra.mxu0 %v60_v11 }
  0x45   :  { %204 = vmatprep.subr.mxu0 %v294_v0 }
  0x48   :  { %205 = vmatpush3.xpose.msra.mxu0 %v59_v12 }
  0x49   :  { %206 = vmatprep.subr.mxu0 %v294_v0 }
  0x4c   :  { %207 = vmatpush3.xpose.msra.mxu0 %v58_v13 }
  0x4d   :  { %208 = vmatprep.subr.mxu0 %v294_v0 }
  0x50   :  { %209 = vmatpush3.xpose.msra.mxu0 %v57_v14 }
  0x51   :  { %210 = vmatprep.subr.mxu0 %v294_v0 }
  0x54   :  { %211 = vmatpush3.xpose.msra.mxu0 %v56_v15 }
  0x55   :  { %212 = vmatprep.subr.mxu0 %v294_v0 }
  0x58   :  { %213 = vmatpush3.xpose.msra.mxu0 %v55_v16 }
  0x5b   :  { %215 = vmatmul.mubr.f32.vlgmr.msra.gmra.mxu0 %v54_v17 }
 0x11b   :  { %v137_v19 = vpop.f32.mrf.mxu0 }
 0x11c   :  { %v141_v20 = vadd.f32 %v164_v18, %v137_v19 }
 0x11d   :  { %v216_v21 = vpop.f32.mrf.mxu0 }
 0x11e   :  { %147 = vst [vmem:[#allocation8] sm:$0xff] %v141_v20 }
 0x11f   :  { %275 = shalt.err (!%p272_p0)
}
 0x120   :  { %157 = dma.vmem_to_hbm [thread:$0]  %s155_s25, 128, %s332_s3, [#allocation5]  }
 0x121   :  { %288 = dma.done.wait [#allocation5], 128  }
 0x122   :  { %289 = vsyncadd [#allocation5], 4294967168 }
 0x123   :  { %161 = vsyncpa [#allocation4], 1 }
 0x124   :  { %162 = vsyncpa [#allocation7], 1 }
 0x125   :  { %163 = vsyncpa [#allocation5], 1 }

</bundles_post_ra>
